<compile_context>
chip_gen: v7x
topology: tpu7x:2x2x1
jax: 0.10.0
libtpu: 0.0.40
codegen_flags: <defaults>
</compile_context>

<pallas_src>
import functools

import jax
import jax.numpy as jnp
from jax.experimental import pallas as pl
from jax.experimental.pallas import tpu as pltpu

_LANE = 128
_MiB = 1024 * 1024


def _cdiv(a, b):
    return -(-a // b)


def _round_down(a, m):
    return (a // m) * m


def _pre_emphasis_kernel(x_ref, halo_ref, o_ref, *, coef):
    """Process one (block_rows, t_block) tile.

    halo_ref[0] holds, for every row of this tile, the sample that precedes
    the tile's first column: x[:, 1] (reflect) for the first T block, the last
    column of the previous T block otherwise. So the 1-sample shift never
    needs data from outside the tile.
    """
    x = x_ref[...]
    c = jnp.asarray(coef, dtype=x.dtype)          # native-dtype math (no f32 upcast)

    # prev[:, t] = x[:, t-1]; column 0 wraps around and is patched below.
    # t_block is a multiple of 128 whenever T >= 128, so the XLU roll always
    # operates on a lane-aligned width.
    prev = pltpu.roll(x, shift=1, axis=1)
    o_ref[...] = (x - c * prev).astype(o_ref.dtype)          # lane-dense store

    # Patch only column 0 (one narrow masked store) instead of a full-width
    # iota/compare/select.
    h = halo_ref[0]                                           # (block_rows, 1)
    o_ref[:, 0:1] = (x[:, 0:1] - c * h).astype(o_ref.dtype)


def _budgets():
    """Returns (per-tile byte target, scoped VMEM limit) per chip generation."""
    vmem_cap = 64 * _MiB
    try:
        vmem_cap = int(getattr(pltpu.get_tpu_info(), "vmem_capacity_bytes", vmem_cap))
    except Exception:
        pass
    if vmem_cap >= 96 * _MiB:          # v4 / v5e / v6e: 128 MiB physical VMEM
        return 4 * _MiB, 64 * _MiB
    return 2 * _MiB, 40 * _MiB         # v7x: 64 MiB physical VMEM


def _choose_tiling(b, t, itemsize, tile_target):
    """Pick (block_rows, t_block) so that:
       * T blocks are multiples of 128 whenever T >= 128,
       * row blocks are multiples of the sublane packing (8 f32 / 16 bf16),
       * each tile is ~tile_target bytes,
       * the grid has >= 2 (>=4 for multi-MiB arrays) steps unless the whole
         array is < 1 MiB, so pipelining / megacore sharding never degenerate.
    """
    sub = max(8, 32 // itemsize)
    total = b * t * itemsize

    if total <= 1 * _MiB:
        min_steps = 1
    elif total <= 4 * _MiB:
        min_steps = 2
    else:
        min_steps = 4

    # ---- T axis ----
    if t < _LANE:
        t_block = t   # TODO(synk): tiny-T fallback keeps a sub-128-lane roll.
    else:
        budget_t = max(_LANE, _round_down(tile_target // (sub * itemsize), _LANE))
        t_block = min(_round_down(t, _LANE), budget_t)
    num_tb = _cdiv(t, t_block)

    # ---- row axis: fill the tile budget ----
    block_rows = _round_down(tile_target // (t_block * itemsize), sub)
    block_rows = int(min(max(sub, block_rows), b))
    if block_rows >= b:
        block_rows = b
    num_rb = _cdiv(b, block_rows)

    # ---- de-degenerate the grid: shrink rows first, then T ----
    if num_rb * num_tb < min_steps and b > sub:
        need_rb = _cdiv(min_steps, num_tb)
        cap = max(sub, _round_down(_cdiv(b, need_rb), sub))
        while cap > sub and _cdiv(b, cap) < need_rb:
            cap -= sub
        block_rows = min(block_rows, cap)
        num_rb = _cdiv(b, block_rows)
    if num_rb * num_tb < min_steps and t_block > _LANE:
        need_tb = _cdiv(min_steps, num_rb)
        cap_t = max(_LANE, _round_down(_cdiv(t, need_tb), _LANE))
        while cap_t > _LANE and _cdiv(t, cap_t) < need_tb:
            cap_t -= _LANE
        t_block = min(t_block, cap_t)
        num_tb = _cdiv(t, t_block)

    return block_rows, t_block


def pre_emphasis(x, *, coef=0.97, block_rows=None, t_block=None, donate_input=False):
    """PreEmphasis forward. x: [B, T] waveforms. Returns same shape/dtype.

    Optional overrides: `block_rows` must be a multiple of 8 (16 for bf16) or
    equal to B; `t_block` must be a multiple of 128 or equal to T. With
    `donate_input=True` the output aliases x (safe: each block only reads its
    own tile plus the pre-gathered halo).
    """
    b, t = x.shape
    assert t >= 2, "reflect padding of width 1 requires T >= 2"

    itemsize = jnp.dtype(x.dtype).itemsize
    tile_target, vmem_limit = _budgets()
    auto_rows, auto_t = _choose_tiling(b, t, itemsize, tile_target)
    block_rows = int(block_rows) if block_rows is not None else auto_rows
    t_block = int(t_block) if t_block is not None else auto_t
    block_rows = min(block_rows, b)
    t_block = min(t_block, t)
    num_rb = _cdiv(b, block_rows)
    num_tb = _cdiv(t, t_block)

    # Per-T-block "previous sample": reflect value x[:, 1] for block 0, the
    # last column of the preceding block otherwise. Shape [num_tb, B, 1] keeps
    # the per-step halo DMA tiny & contiguous and its BlockSpec layout-legal.
    first = x[:, 1:2]
    if num_tb > 1:
        rest = x[:, t_block - 1:: t_block][:, : num_tb - 1]
        halo2d = jnp.concatenate([first, rest], axis=1)        # [B, num_tb]
    else:
        halo2d = first
    halo = jnp.transpose(halo2d)[:, :, None]                   # [num_tb, B, 1]

    kernel = functools.partial(_pre_emphasis_kernel, coef=float(coef))

    return pl.pallas_call(
        kernel,
        out_shape=jax.ShapeDtypeStruct((b, t), x.dtype),
        grid_spec=pltpu.PrefetchScalarGridSpec(
            num_scalar_prefetch=0,
            grid=(num_rb, num_tb),
            in_specs=[
                pl.BlockSpec((block_rows, t_block), lambda i, j: (i, j)),
                pl.BlockSpec((1, block_rows, 1), lambda i, j: (j, i, 0)),
            ],
            out_specs=pl.BlockSpec((block_rows, t_block), lambda i, j: (i, j)),
        ),
        compiler_params=pltpu.CompilerParams(
            dimension_semantics=("parallel", "parallel"),
            vmem_limit_bytes=vmem_limit,
        ),
        cost_estimate=pl.CostEstimate(
            flops=2 * b * t,
            transcendentals=0,
            bytes_accessed=2 * b * t * itemsize,
        ),
        input_output_aliases=({0: 0} if donate_input else {}),
    )(x, halo)


def _pre_emphasis_ref(x, coef=0.97):
    prev = jnp.concatenate([x[:, 1:2], x[:, :-1]], axis=1)
    return x - coef * prev


if __name__ == "__main__":
    k1, k2, k3 = jax.random.split(jax.random.PRNGKey(0), 3)
    coef = 0.97

    # 1) Typical small waveform batch, auto tiling.
    B, T = 16, 512
    x1 = jax.random.normal(k1, (B, T), dtype=jnp.float32)
    y1 = jax.block_until_ready(pre_emphasis(x1, coef=coef))
    assert y1.shape == (B, T) and y1.dtype == x1.dtype
    assert jnp.allclose(y1, _pre_emphasis_ref(x1, coef), atol=1e-5, rtol=1e-5)

    # 2) T not a multiple of 128 and B not a multiple of 8: auto path tiles T
    #    into 128 + a partial block, exercising the halo seam (reviewer's
    #    roll-alignment concern is avoided by construction).
    x2 = jax.random.normal(k2, (20, 130), dtype=jnp.float32)
    y2 = jax.block_until_ready(pre_emphasis(x2, coef=coef))
    assert jnp.allclose(y2, _pre_emphasis_ref(x2, coef), atol=1e-5, rtol=1e-5)

    # 3) Forced multi-block grid in both axes with partial edge tiles
    #    (3 row blocks x 5 T blocks -> software pipelining + halo seams).
    x3 = jax.random.normal(k3, (20, 1152), dtype=jnp.float32)
    y3 = jax.block_until_ready(pre_emphasis(x3, coef=coef, block_rows=8, t_block=256))
    assert jnp.allclose(y3, _pre_emphasis_ref(x3, coef), atol=1e-5, rtol=1e-5)

    # 4) bf16 native-dtype path (no f32 upcast inside the kernel).
    xb = x1.astype(jnp.bfloat16)
    yb = jax.block_until_ready(pre_emphasis(xb, coef=coef))
    cb = float(jnp.asarray(coef, jnp.bfloat16))
    refb = _pre_emphasis_ref(xb.astype(jnp.float32), cb)
    assert yb.dtype == jnp.bfloat16
    assert jnp.allclose(yb.astype(jnp.float32), refb, atol=1e-1, rtol=5e-2)

    print("KERNEL_OK")
</pallas_src>

<mosaic_0001>
module attributes {stable_mosaic.version = 11 : i64} {
  func.func @_pre_emphasis_kernel(%arg0: i32, %arg1: i32, %arg2: memref<16x512xf32, #tpu.memory_space<vmem>>, %arg3: memref<1x16x1xf32, #tpu.memory_space<vmem>>, %arg4: memref<16x512xf32, #tpu.memory_space<vmem>>) attributes {dimension_semantics = [#tpu.dimension_semantics<parallel>, #tpu.dimension_semantics<parallel>], iteration_bounds = array<i64: 1, 1>, scalar_prefetch = 0 : i64, scratch_operands = 0 : i64, tpu.core_type = #tpu.core_type<tc>, window_params = [{transform_indices = @transform_0, window_bounds = array<i64: 16, 512>}, {transform_indices = @transform_1, window_bounds = array<i64: 1, 16, 1>}, {transform_indices = @transform_2, window_bounds = array<i64: 16, 512>}]} {
    %c0 = arith.constant 0 : index
    %c0_0 = arith.constant 0 : index
    %0 = vector.load %arg2[%c0, %c0_0] : memref<16x512xf32, #tpu.memory_space<vmem>>, vector<16x512xf32>
    %c1_i32 = arith.constant 1 : i32
    %1 = tpu.dynamic_rotate %0 by %c1_i32 dim 1 : vector<16x512xf32>, i32 -> vector<16x512xf32>
    %cst = arith.constant 9.700000e-01 : f32
    %2 = vector.broadcast %cst : f32 to vector<16x512xf32>
    %3 = arith.mulf %2, %1 : vector<16x512xf32>
    %4 = arith.subf %0, %3 : vector<16x512xf32>
    %c0_1 = arith.constant 0 : index
    %c0_2 = arith.constant 0 : index
    %5 = vector.load %arg4[%c0_1, %c0_2] : memref<16x512xf32, #tpu.memory_space<vmem>>, vector<16x512xf32>
    tpu.vector_store %arg4[%c0_1, %c0_2], %4 {strides = array<i32>} : memref<16x512xf32, #tpu.memory_space<vmem>>, vector<16x512xf32>,
    %c0_3 = arith.constant 0 : index
    %c0_4 = arith.constant 0 : index
    %c0_5 = arith.constant 0 : index
    %6 = vector.load %arg3[%c0_3, %c0_4, %c0_5] : memref<1x16x1xf32, #tpu.memory_space<vmem>>, vector<1x16x1xf32>
    %7 = vector.shape_cast %6 : vector<1x16x1xf32> to vector<16x1xf32>
    %8 = vector.extract_strided_slice %0 {offsets = [0, 0], sizes = [16, 1], strides = [1, 1]} : vector<16x512xf32> to vector<16x1xf32>
    %cst_6 = arith.constant 9.700000e-01 : f32
    %9 = vector.broadcast %cst_6 : f32 to vector<16x1xf32>
    %10 = arith.mulf %9, %7 : vector<16x1xf32>
    %11 = arith.subf %8, %10 : vector<16x1xf32>
    %c0_7 = arith.constant 0 : index
    %c0_8 = arith.constant 0 : index
    %12 = vector.load %arg4[%c0_7, %c0_8] : memref<16x512xf32, #tpu.memory_space<vmem>>, vector<16x1xf32>
    tpu.vector_store %arg4[%c0_7, %c0_8], %11 {strides = array<i32>} : memref<16x512xf32, #tpu.memory_space<vmem>>, vector<16x1xf32>,
    return
  }
  func.func @transform_0(%arg0: i32, %arg1: i32) -> (i32, i32) {
    %c0_i32 = arith.constant 0 : i32
    return %arg0, %arg1 : i32, i32
  }
  func.func @transform_1(%arg0: i32, %arg1: i32) -> (i32, i32, i32) {
    %c0_i32 = arith.constant 0 : i32
    %c0_i32_0 = arith.constant 0 : i32
    return %arg1, %arg0, %c0_i32 : i32, i32, i32
  }
  func.func @transform_2(%arg0: i32, %arg1: i32) -> (i32, i32) {
    %c0_i32 = arith.constant 0 : i32
    return %arg0, %arg1 : i32, i32
  }
}

</mosaic_0001>

<bundles_post_ra>
// kernel: tpu_custom_call.1
= control target key start
LH: loop header
LB: loop body
LE: loop exit
PB: predicated region body
PF: predicated region fallthrough
CT: control target
= control target key end

     0   :  { %7 = vsyncpa [#allocation3], 0  ;;  %s238_s0 = inlined_call_operand.hbm [shape: f32[16,512], index: 0, kind: input, shape index: {}]   ;;  %s239_s1 = inlined_call_operand.vmem [shape: f32[1,16,1], index: 1, kind: input, shape index: {}]   ;;  %s240_s2 = inlined_call_operand.hbm [shape: f32[16,512], index: 2, kind: output, shape index: {}]  }
   0x1   :  { %8 = vsyncpa [#allocation4], 0  ;;  %s164_s9 = smov [#allocation2]   ;;  %s116_s13 = scalar_lea.hbm %s238_s0, 1024 }
   0x2   :  { %s14_s10 = sshll.u32 %s164_s9, 4  ;;  %p117_p0 = scmp.ne.s32.totalorder %s238_s0, %s116_s13  ;;  %s15_s10 = int_to_ptr.vmem [resolvable:$true] %s14_s10 }
   0x3   :  { %p120_p1 = scmp.lt.u32.totalorder %s116_s13, %s238_s0 }
   0x5   :  { %p122_p2 = pnand %p120_p1, %p117_p0 }
   0x7   :  { %125 = shalt.err (!%p122_p2)
}
   0x8   :  { %s126_s18 = scalar_lea.vmem %s15_s10, 1024  ;;  %p131_p4 = scmp.lt.s32.totalorder %s15_s10, %s15_s10 }
   0x9   :  { %p127_p3 = scmp.ne.s32.totalorder %s15_s10, %s126_s18  ;;  %p132_p5 = scmp.lt.s32.totalorder %s126_s18, %s126_s18 }
   0xb   :  { %p133_p6 = por %p132_p5, %p131_p4 }
   0xd   :  { %p134_p7 = pnand %p133_p6, %p127_p3 }
   0xf   :  { %137 = shalt.err (!%p134_p7)
}
  0x10   :  { %s165_s19 = smov 512   ;;  %s166_s20 = smov 32  }
  0x11   :  { %20 = dma.hbm_to_vmem [thread:$0]  %s238_s0, 1024, %s15_s10, [#allocation3], %s165_s19, %s165_s19, %s166_s20  }
  0x12   :  { %160 = dma.done.wait [#allocation3], 1024  }
  0x13   :  { %161 = vsyncadd [#allocation3], 4294966272  ;;  %v199_v0 = vld [vmem:[#allocation2 + $0x18] sm:$0xff]  ;;  %v26_v1 = vld [vmem:[#allocation2] sm:$0xff]  ;;  %s167_s23 = smov 1   ;;  %v50_v8 = vlaneseq  ;;  %vm91_vm1 = vcmask 7168  }
  0x14   :  { %46 = vrot.lane.b32.xlu1 %v199_v0, %s167_s23  ;;  %34 = vrot.lane.b32.xlu0 %v26_v1, %s167_s23  ;;  %v202_v2 = vld [vmem:[#allocation2 + $0x38] sm:$0xff]  ;;  %v30_v3 = vld [vmem:[#allocation2 + $0x20] sm:$0xff]  ;;  %v31_v4 = vld [vmem:[#allocation2 + $0x28] sm:$0xff] }
  0x15   :  { %v27_v5 = vld [vmem:[#allocation2 + $0x8] sm:$0xff]  ;;  %v32_v6 = vld [vmem:[#allocation2 + $0x30] sm:$0xff]  ;;  %v51_v9 = vand.u32 127, %v50_v8  ;;  %v85_v10 = vld [vmem:[%s239_s1] sm:$0xff] }
  0x16   :  { %v28_v7 = vld [vmem:[#allocation2 + $0x10] sm:$0xff]  ;;  %v87_v11 = vmul.f32 0.97, %v85_v10  ;;  %v86_v12 = vld [vmem:[%s239_s1 + $0x8] sm:$0xff]  ;;  %s168_s1 = smov [#allocation5]  }
  0x17   :  { %vm52_vm0 = vcmp.lt.s32.totalorder %v51_v9, 1  ;;  %v88_v18 = vmul.f32 0.97, %v86_v12  ;;  %s99_s27 = sshll.u32 %s168_s1, 4  ;;  %s100_s27 = int_to_ptr.vmem [resolvable:$true] %s99_s27 }
  0x18   :  { %48 = vrot.lane.b32.xlu1 %v202_v2, %s167_s23  ;;  %36 = vrot.lane.b32.xlu0 %v30_v3, %s167_s23  ;;  %v89_v17 = vsub.f32 %v26_v1, %v87_v11  ;;  %s138_s28 = scalar_lea.vmem %s100_s27, 1024  ;;  %p143_p9 = scmp.lt.s32.totalorder %s100_s27, %s100_s27 }
  0x19   :  { %v90_v24 = vsub.f32 %v30_v3, %v88_v18  ;;  %p139_p8 = scmp.ne.s32.totalorder %s100_s27, %s138_s28  ;;  %p144_p10 = scmp.lt.s32.totalorder %s138_s28, %s138_s28 }
  0x1b   :  { %p145_p11 = por %p144_p10, %p143_p9 }
  0x1c   :  { %40 = vrot.lane.b32.xlu1 %v31_v4, %s167_s23  ;;  %38 = vrot.lane.b32.xlu0 %v27_v5, %s167_s23 }
  0x1d   :  { %p146_p12 = pnand %p145_p11, %p139_p8 }
  0x20   :  { %44 = vrot.lane.b32.xlu1 %v32_v6, %s167_s23  ;;  %42 = vrot.lane.b32.xlu0 %v28_v7, %s167_s23 }
  0x86   :  { %v47_v13 = vpop.permute.xlu1 %46  ;;  %v35_v14 = vpop.permute.xlu0 %34 }
  0x87   :  { %v59_v15 = vsel %vm52_vm0, %v47_v13, %v35_v14 }
  0x88   :  { %v61_v16 = vmul.f32 0.97, %v59_v15 }
  0x8a   :  { %v69_v19 = vsub.f32 %v26_v1, %v61_v16  ;;  %v49_v20 = vpop.permute.xlu1 %48  ;;  %v37_v21 = vpop.permute.xlu0 %36 }
  0x8b   :  { %v60_v22 = vsel %vm52_vm0, %v49_v20, %v37_v21 }
  0x8c   :  { %77 = vst [vmem:[#allocation5] sm:$0xff] %v69_v19  ;;  %v65_v23 = vmul.f32 0.97, %v60_v22 }
  0x8d   :  { %92 = vst.msk [vmem:[#allocation5] sm:$0xff] %vm91_vm1, %v89_v17 }
  0x8e   :  { %v73_v25 = vsub.f32 %v30_v3, %v65_v23  ;;  %v41_v26 = vpop.permute.xlu1 %40  ;;  %v39_v27 = vpop.permute.xlu0 %38 }
  0x8f   :  { %v58_v28 = vsel %vm52_vm0, %v37_v21, %v41_v26  ;;  %v57_v29 = vsel %vm52_vm0, %v35_v14, %v39_v27 }
  0x90   :  { %81 = vst [vmem:[#allocation5 + $0x20] sm:$0xff] %v73_v25  ;;  %v66_v30 = vmul.f32 0.97, %v58_v28  ;;  %v62_v31 = vmul.f32 0.97, %v57_v29 }
  0x91   :  { %93 = vst.msk [vmem:[#allocation5 + $0x20] sm:$0xff] %vm91_vm1, %v90_v24 }
  0x92   :  { %v74_v32 = vsub.f32 %v31_v4, %v66_v30  ;;  %v70_v33 = vsub.f32 %v27_v5, %v62_v31  ;;  %v45_v34 = vpop.permute.xlu1 %44  ;;  %v43_v35 = vpop.permute.xlu0 %42 }
  0x93   :  { %v54_v36 = vsel %vm52_vm0, %v45_v34, %v49_v20  ;;  %v56_v37 = vsel %vm52_vm0, %v41_v26, %v45_v34  ;;  %v53_v38 = vsel %vm52_vm0, %v43_v35, %v47_v13  ;;  %v55_v39 = vsel %vm52_vm0, %v39_v27, %v43_v35 }
  0x94   :  { %82 = vst [vmem:[#allocation5 + $0x28] sm:$0xff] %v74_v32  ;;  %78 = vst [vmem:[#allocation5 + $0x8] sm:$0xff] %v70_v33  ;;  %v67_v40 = vmul.f32 0.97, %v56_v37  ;;  %v68_v41 = vmul.f32 0.97, %v54_v36 }
  0x95   :  { %v63_v42 = vmul.f32 0.97, %v55_v39  ;;  %v64_v43 = vmul.f32 0.97, %v53_v38 }
  0x96   :  { %v75_v44 = vsub.f32 %v32_v6, %v67_v40  ;;  %v76_v45 = vsub.f32 %v202_v2, %v68_v41 }
  0x97   :  { %v71_v46 = vsub.f32 %v28_v7, %v63_v42  ;;  %v72_v47 = vsub.f32 %v199_v0, %v64_v43 }
  0x98   :  { %83 = vst [vmem:[#allocation5 + $0x30] sm:$0xff] %v75_v44  ;;  %84 = vst [vmem:[#allocation5 + $0x38] sm:$0xff] %v76_v45 }
  0x99   :  { %79 = vst [vmem:[#allocation5 + $0x10] sm:$0xff] %v71_v46  ;;  %80 = vst [vmem:[#allocation5 + $0x18] sm:$0xff] %v72_v47 }
  0x9a   :  { %149 = shalt.err (!%p146_p12)
}
  0x9b   :  { %s150_s3 = scalar_lea.hbm %s240_s2, 1024 }
  0x9c   :  { %p151_p13 = scmp.ne.s32.totalorder %s240_s2, %s150_s3  ;;  %p154_p0 = scmp.lt.u32.totalorder %s150_s3, %s240_s2 }
  0x9e   :  { %p156_p1 = pnand %p154_p0, %p151_p13 }
  0xa0   :  { %159 = shalt.err (!%p156_p1)
}
  0xa1   :  { %105 = dma.vmem_to_hbm [thread:$0]  %s100_s27, 1024, %s240_s2, [#allocation4], %s165_s19, %s165_s19, %s166_s20  }
  0xa2   :  { %162 = dma.done.wait [#allocation4], 1024  }
  0xa3   :  { %163 = vsyncadd [#allocation4], 4294966272 }
  0xa4   :  { %109 = vsyncpa [#allocation3], 1 }
  0xa5   :  { %110 = vsyncpa [#allocation4], 1 }

</bundles_post_ra>
